<compile_context>
chip_gen: v7x
topology: tpu7x:2x2x1
jax: 0.10.0
libtpu: 0.0.40
codegen_flags: <defaults>
</compile_context>

<pallas_src>
import jax
import jax.numpy as jnp
from jax.experimental import pallas as pl
from jax.experimental.pallas import tpu as pltpu


def _round_up(x: int, m: int) -> int:
    return (x + m - 1) // m * m


def _conditioner_kernel(x_ref, w_ref, m_ref, pad_ref, o_ref):
    # Cast activations to bf16 on the VPU (cheap, hidden under the pipeline) so
    # the MXU runs its native bf16 path; accumulate in f32.
    x = x_ref[...].astype(jnp.bfloat16)
    y = jnp.dot(x, w_ref[...], preferred_element_type=jnp.float32)
    valid = m_ref[...] != 0                       # (TN, 1) bool, broadcasts over lanes
    o_ref[...] = jnp.where(valid, y, pad_ref[...]).astype(o_ref.dtype)


def base_conditioner_forward(cond, mask, weight, learnt_padding=None, *, pad_empty=True):
    """JAX/Pallas equivalent of BaseConditioner.forward (force_linear=True path).

    Args:
      cond:           [B, T, D] float32 (output of _get_condition).
      mask:           [B, T] bool.
      weight:         [D_out, D] float32 (nn.Linear weight, bias=False).
      learnt_padding: [1, 1, D_out] float32, or None (learn_padding=False).
    Returns:
      (condition [B, T, D_out] float32, mask [B, T] bool)
    """
    B, T, D = cond.shape
    D_out = weight.shape[0]
    out_dtype = cond.dtype

    if T == 0:
        # PyTorch's pad_empty branch zeroes cond/mask but keeps T == 0, so the
        # projected condition is an empty tensor either way.
        mask_out = jnp.zeros((B, T), dtype=jnp.bool_) if pad_empty else mask
        return jnp.zeros((B, T, D_out), dtype=out_dtype), mask_out

    N = B * T
    Dop = _round_up(D_out, 128)                 # lane-dense output stores

    # ---- one-time (amortized) parameter prep in the wrapper -----------------
    x = cond.reshape(N, D)                      # free collapse of leading dims
    m = mask.reshape(N, 1).astype(jnp.int32)    # vreg-word sized mask column
    wt = weight.T.astype(jnp.bfloat16)          # [D, D_out]; no in-kernel transpose
    if learnt_padding is None:
        pad = jnp.zeros((1, D_out), dtype=jnp.float32)   # learn_padding=False
    else:
        pad = learnt_padding.reshape(1, D_out).astype(jnp.float32)
    if Dop != D_out:
        wt = jnp.pad(wt, ((0, 0), (0, Dop - D_out)))     # zero lanes, sliced off later
        pad = jnp.pad(pad, ((0, 0), (0, Dop - D_out)))

    # ---- tile selection (VMEM-budget safe on v5e / v6e / v7x) ----------------
    VMEM_BUDGET = 20 * 1024 * 1024              # working-set target, < 32 MiB limit
    w_bytes = D * Dop * 2                       # bf16 weight
    weight_resident = w_bytes <= VMEM_BUDGET // 2
    if weight_resident:
        TNo = Dop                               # one column tile -> weight resident
        w_vmem = w_bytes                        # single-buffered via pl.Buffered(1)
    else:
        # Weight too large to keep resident (e.g. 4096x4096 on v7x): tile D_out
        # and stream double-buffered column slabs of the weight.
        TNo = 512
        while D * TNo * 2 > VMEM_BUDGET // 2 and TNo > 128:
            TNo //= 2
        w_vmem = 2 * D * TNo * 2

    # Double-buffered f32 x tile + f32 out tile + int32 mask column, per row.
    per_row = 2 * (D * 4 + TNo * 4 + 4)
    avail = max(VMEM_BUDGET - w_vmem, 16 * per_row)
    TN = min(1024, max(8, (avail // per_row) // 8 * 8))
    # Keep >= 2 row-grid steps so v7x can shard rows across its 2 TensorCores.
    TN = max(8, min(TN, _round_up(-(-N // 2), 8)))

    grid = (pl.cdiv(N, TN), pl.cdiv(Dop, TNo))

    def _call(resident_kw):
        in_specs = [
            pl.BlockSpec((TN, D), lambda i, j: (i, 0)),                    # activations
            pl.BlockSpec((D, TNo), lambda i, j: (0, j), **resident_kw),    # weight
            pl.BlockSpec((TN, 1), lambda i, j: (i, 0)),                    # mask column
            pl.BlockSpec((1, TNo), lambda i, j: (0, j), **resident_kw),    # learnt pad
        ]
        return pl.pallas_call(
            _conditioner_kernel,
            out_shape=jax.ShapeDtypeStruct((N, Dop), out_dtype),
            grid=grid,
            in_specs=in_specs,
            out_specs=pl.BlockSpec((TN, TNo), lambda i, j: (i, j)),
            compiler_params=pltpu.CompilerParams(
                dimension_semantics=("parallel", "parallel"),
                vmem_limit_bytes=32 * 1024 * 1024,
            ),
            cost_estimate=pl.CostEstimate(
                flops=2 * N * D * Dop,
                transcendentals=0,
                bytes_accessed=(x.nbytes + wt.nbytes + m.nbytes + pad.nbytes
                                + N * Dop * 4),
            ),
        )(x, wt, m, pad)

    if weight_resident:
        try:
            out = _call(dict(pipeline_mode=pl.Buffered(buffer_count=1)))
        except Exception:
            # TODO(synk): single-buffered resident operands (pl.Buffered(1)) not
            # supported by this jax build; fall back to default double-buffering.
            out = _call({})
    else:
        out = _call({})

    if Dop != D_out:
        out = out[:, :D_out]
    return out.reshape(B, T, D_out), mask


if __name__ == "__main__":
    # Small config consistent with BaseConditioner(dim, output_dim,
    # force_linear=True, output_bias=False, learn_padding=True).
    B, T = 2, 8
    dim, output_dim = 32, 48

    key = jax.random.PRNGKey(0)
    k_cond, k_mask, k_w, k_pad = jax.random.split(key, 4)

    # Synthetic _get_condition outputs: dense embedding + validity mask.
    cond = jax.random.normal(k_cond, (B, T, dim), dtype=jnp.float32)
    mask = jax.random.uniform(k_mask, (B, T)) > 0.3                # bool [B, T]

    # Parameters (shapes from __init__):
    #   output_proj = nn.Linear(dim, output_dim, bias=False) -> weight [output_dim, dim]
    #   learnt_padding = randn(1, 1, output_dim) * 0.2
    weight = jax.random.normal(k_w, (output_dim, dim), dtype=jnp.float32) / jnp.sqrt(dim)
    learnt_padding = jax.random.normal(k_pad, (1, 1, output_dim), dtype=jnp.float32) * 0.2

    out_cond, out_mask = base_conditioner_forward(cond, mask, weight, learnt_padding)
    out_cond = jax.block_until_ready(out_cond)

    # Pure-JAX reference with the same bf16 operand rounding (f32 accumulate),
    # matching the kernel's MXU path; the masked blend itself is exact.
    cond_q = cond.astype(jnp.bfloat16).astype(jnp.float32)
    w_q = weight.astype(jnp.bfloat16).astype(jnp.float32)
    ref = jnp.einsum("btd,od->bto", cond_q, w_q)
    maskf = mask.astype(jnp.float32)[..., None]
    ref = ref * maskf + learnt_padding * (1.0 - maskf)

    assert out_cond.shape == (B, T, output_dim)
    assert out_mask.dtype == jnp.bool_
    assert jnp.allclose(out_cond, ref, atol=1e-3, rtol=1e-3), (
        float(jnp.max(jnp.abs(out_cond - ref))))
    print("KERNEL_OK")
</pallas_src>

<mosaic_0001>
module attributes {stable_mosaic.version = 11 : i64} {
  func.func @_conditioner_kernel(%arg0: i32, %arg1: i32, %arg2: memref<8x32xf32, #tpu.memory_space<vmem>>, %arg3: memref<32x128xbf16, #tpu.memory_space<vmem>>, %arg4: memref<8x1xi32, #tpu.memory_space<vmem>>, %arg5: memref<1x128xf32, #tpu.memory_space<vmem>>, %arg6: memref<8x128xf32, #tpu.memory_space<vmem>>) attributes {dimension_semantics = [#tpu.dimension_semantics<parallel>, #tpu.dimension_semantics<parallel>], iteration_bounds = array<i64: 2, 1>, scalar_prefetch = 0 : i64, scratch_operands = 0 : i64, tpu.core_type = #tpu.core_type<tc>, window_params = [{transform_indices = @transform_0, window_bounds = array<i64: 8, 32>}, {pipeline_mode = #tpu.pipeline_mode<synchronous>, transform_indices = @transform_1, window_bounds = array<i64: 32, 128>}, {transform_indices = @transform_2, window_bounds = array<i64: 8, 1>}, {pipeline_mode = #tpu.pipeline_mode<synchronous>, transform_indices = @transform_3, window_bounds = array<i64: 1, 128>}, {transform_indices = @transform_4, window_bounds = array<i64: 8, 128>}]} {
    %c0 = arith.constant 0 : index
    %c0_0 = arith.constant 0 : index
    %0 = vector.load %arg2[%c0, %c0_0] : memref<8x32xf32, #tpu.memory_space<vmem>>, vector<8x32xf32>
    %1 = arith.truncf %0 : vector<8x32xf32> to vector<8x32xbf16>
    %c0_1 = arith.constant 0 : index
    %c0_2 = arith.constant 0 : index
    %2 = vector.load %arg3[%c0_1, %c0_2] : memref<32x128xbf16, #tpu.memory_space<vmem>>, vector<32x128xbf16>
    %cst = arith.constant dense<0.000000e+00> : vector<8x128xf32>
    %3 = tpu.matmul %1, %2, %cst {dimension_numbers = #tpu.dot_dimension_numbers<[1], [0], [0], [1], [0, 0, 1, 1], [], []>} : vector<8x32xbf16>, vector<32x128xbf16>, vector<8x128xf32> -> vector<8x128xf32>
    %c0_3 = arith.constant 0 : index
    %c0_4 = arith.constant 0 : index
    %4 = vector.load %arg4[%c0_3, %c0_4] : memref<8x1xi32, #tpu.memory_space<vmem>>, vector<8x1xi32>
    %c0_i32 = arith.constant 0 : i32
    %5 = vector.broadcast %c0_i32 : i32 to vector<8x1xi32>
    %6 = arith.cmpi ne, %4, %5 : vector<8x1xi32>
    %c0_5 = arith.constant 0 : index
    %c0_6 = arith.constant 0 : index
    %7 = vector.load %arg5[%c0_5, %c0_6] : memref<1x128xf32, #tpu.memory_space<vmem>>, vector<1x128xf32>
    %8 = vector.shape_cast %6 : vector<8x1xi1> to vector<8x1xi1>
    %9 = vector.broadcast %8 : vector<8x1xi1> to vector<8x128xi1>
    %10 = vector.shape_cast %7 : vector<1x128xf32> to vector<1x128xf32>
    %11 = vector.broadcast %10 : vector<1x128xf32> to vector<8x128xf32>
    %12 = arith.select %9, %3, %11 : vector<8x128xi1>, vector<8x128xf32>
    %c0_7 = arith.constant 0 : index
    %c0_8 = arith.constant 0 : index
    %13 = vector.load %arg6[%c0_7, %c0_8] : memref<8x128xf32, #tpu.memory_space<vmem>>, vector<8x128xf32>
    tpu.vector_store %arg6[%c0_7, %c0_8], %12 {strides = array<i32>} : memref<8x128xf32, #tpu.memory_space<vmem>>, vector<8x128xf32>,
    return
  }
  func.func @transform_0(%arg0: i32, %arg1: i32) -> (i32, i32) {
    %c0_i32 = arith.constant 0 : i32
    %c0_i32_0 = arith.constant 0 : i32
    return %arg0, %c0_i32 : i32, i32
  }
  func.func @transform_1(%arg0: i32, %arg1: i32) -> (i32, i32) {
    %c0_i32 = arith.constant 0 : i32
    %c0_i32_0 = arith.constant 0 : i32
    return %c0_i32, %arg1 : i32, i32
  }
  func.func @transform_2(%arg0: i32, %arg1: i32) -> (i32, i32) {
    %c0_i32 = arith.constant 0 : i32
    %c0_i32_0 = arith.constant 0 : i32
    return %arg0, %c0_i32 : i32, i32
  }
  func.func @transform_3(%arg0: i32, %arg1: i32) -> (i32, i32) {
    %c0_i32 = arith.constant 0 : i32
    %c0_i32_0 = arith.constant 0 : i32
    return %c0_i32, %arg1 : i32, i32
  }
  func.func @transform_4(%arg0: i32, %arg1: i32) -> (i32, i32) {
    %c0_i32 = arith.constant 0 : i32
    return %arg0, %arg1 : i32, i32
  }
}

module attributes {stable_mosaic.version = 11 : i64} {
  func.func @_conditioner_kernel(%arg0: i32, %arg1: i32, %arg2: memref<8x32xf32, #tpu.memory_space<vmem>>, %arg3: memref<32x128xbf16, #tpu.memory_space<vmem>>, %arg4: memref<8x1xi32, #tpu.memory_space<vmem>>, %arg5: memref<1x128xf32, #tpu.memory_space<vmem>>, %arg6: memref<8x128xf32, #tpu.memory_space<vmem>>) attributes {dimension_semantics = [#tpu.dimension_semantics<parallel>, #tpu.dimension_semantics<parallel>], iteration_bounds = array<i64: 2, 1>, scalar_prefetch = 0 : i64, scratch_operands = 0 : i64, tpu.core_type = #tpu.core_type<tc>, window_params = [{transform_indices = @transform_0, window_bounds = array<i64: 8, 32>}, {transform_indices = @transform_1, window_bounds = array<i64: 32, 128>}, {transform_indices = @transform_2, window_bounds = array<i64: 8, 1>}, {transform_indices = @transform_3, window_bounds = array<i64: 1, 128>}, {transform_indices = @transform_4, window_bounds = array<i64: 8, 128>}]} {
    %c0 = arith.constant 0 : index
    %c0_0 = arith.constant 0 : index
    %0 = vector.load %arg2[%c0, %c0_0] : memref<8x32xf32, #tpu.memory_space<vmem>>, vector<8x32xf32>
    %1 = arith.truncf %0 : vector<8x32xf32> to vector<8x32xbf16>
    %c0_1 = arith.constant 0 : index
    %c0_2 = arith.constant 0 : index
    %2 = vector.load %arg3[%c0_1, %c0_2] : memref<32x128xbf16, #tpu.memory_space<vmem>>, vector<32x128xbf16>
    %cst = arith.constant dense<0.000000e+00> : vector<8x128xf32>
    %3 = tpu.matmul %1, %2, %cst {dimension_numbers = #tpu.dot_dimension_numbers<[1], [0], [0], [1], [0, 0, 1, 1], [], []>} : vector<8x32xbf16>, vector<32x128xbf16>, vector<8x128xf32> -> vector<8x128xf32>
    %c0_3 = arith.constant 0 : index
    %c0_4 = arith.constant 0 : index
    %4 = vector.load %arg4[%c0_3, %c0_4] : memref<8x1xi32, #tpu.memory_space<vmem>>, vector<8x1xi32>
    %c0_i32 = arith.constant 0 : i32
    %5 = vector.broadcast %c0_i32 : i32 to vector<8x1xi32>
    %6 = arith.cmpi ne, %4, %5 : vector<8x1xi32>
    %c0_5 = arith.constant 0 : index
    %c0_6 = arith.constant 0 : index
    %7 = vector.load %arg5[%c0_5, %c0_6] : memref<1x128xf32, #tpu.memory_space<vmem>>, vector<1x128xf32>
    %8 = vector.shape_cast %6 : vector<8x1xi1> to vector<8x1xi1>
    %9 = vector.broadcast %8 : vector<8x1xi1> to vector<8x128xi1>
    %10 = vector.shape_cast %7 : vector<1x128xf32> to vector<1x128xf32>
    %11 = vector.broadcast %10 : vector<1x128xf32> to vector<8x128xf32>
    %12 = arith.select %9, %3, %11 : vector<8x128xi1>, vector<8x128xf32>
    %c0_7 = arith.constant 0 : index
    %c0_8 = arith.constant 0 : index
    %13 = vector.load %arg6[%c0_7, %c0_8] : memref<8x128xf32, #tpu.memory_space<vmem>>, vector<8x128xf32>
    tpu.vector_store %arg6[%c0_7, %c0_8], %12 {strides = array<i32>} : memref<8x128xf32, #tpu.memory_space<vmem>>, vector<8x128xf32>,
    return
  }
  func.func @transform_0(%arg0: i32, %arg1: i32) -> (i32, i32) {
    %c0_i32 = arith.constant 0 : i32
    %c0_i32_0 = arith.constant 0 : i32
    return %arg0, %c0_i32 : i32, i32
  }
  func.func @transform_1(%arg0: i32, %arg1: i32) -> (i32, i32) {
    %c0_i32 = arith.constant 0 : i32
    %c0_i32_0 = arith.constant 0 : i32
    return %c0_i32, %arg1 : i32, i32
  }
  func.func @transform_2(%arg0: i32, %arg1: i32) -> (i32, i32) {
    %c0_i32 = arith.constant 0 : i32
    %c0_i32_0 = arith.constant 0 : i32
    return %arg0, %c0_i32 : i32, i32
  }
  func.func @transform_3(%arg0: i32, %arg1: i32) -> (i32, i32) {
    %c0_i32 = arith.constant 0 : i32
    %c0_i32_0 = arith.constant 0 : i32
    return %c0_i32, %arg1 : i32, i32
  }
  func.func @transform_4(%arg0: i32, %arg1: i32) -> (i32, i32) {
    %c0_i32 = arith.constant 0 : i32
    return %arg0, %arg1 : i32, i32
  }
}

</mosaic_0001>

<bundles_post_ra>
// kernel: tpu_custom_call.1
= control target key start
LH: loop header
LB: loop body
LE: loop exit
PB: predicated region body
PF: predicated region fallthrough
CT: control target
= control target key end

     0   :  { %9 = vsyncpa [#allocation3], 0  ;;  %s864_s0 = inlined_call_operand.vmem [shape: f32[16,32], index: 0, kind: input, shape index: {}]   ;;  %s865_s1 = inlined_call_operand.hbm [shape: bf16[32,128], index: 1, kind: input, shape index: {}]   ;;  %s866_s2 = inlined_call_operand.vmem [shape: s32[16,1], index: 2, kind: input, shape index: {}]   ;;  %s867_s3 = inlined_call_operand.vmem [shape: f32[1,128], index: 3, kind: input, shape index: {}]   ;;  %s868_s4 = inlined_call_operand.hbm [shape: f32[16,128], index: 4, kind: output, shape index: {}]  }
   0x1   :  { %10 = vsyncpa [#allocation4], 0 }
   0x2   :  { %12 = vsyncpa [#allocation4 + $0x1], 0  ;;  %s708_s15 = smov 0   ;;  %s710_s16 = smov 0  }
   0x3   :  { %s712_s17 = smov 0   ;;  %s714_s18 = smov 0  }
   0x4   :  { %s716_s19 = smov 0   ;;  %s718_s20 = smov 0  }
   0x5 LB: > { %s460_s21 = sadd.s32 4294967295, %s674_s20   ;;  %s461_s22 = sadd.s32 4294967294, %s674_s20   ;;  %s674_s20 = sphi %s718_s20, %s18_s20   ;;  %s670_s19 = sphi %s716_s19, %s886_s19   ;;  %s666_s18 = sphi %s714_s18, %s885_s18   ;;  %s662_s17 = sphi %s712_s17, %s884_s17   ;;  %s658_s16 = sphi %s710_s16, %s883_s16   ;;  %s654_s15 = sphi %s708_s15, %s882_s15  }
   0x6   : > { %s30_s23 = sadd.s32 1, %s670_s19  ;;  %s143_s24 = sadd.s32 1, %s662_s17 }
   0x7   : > { %p32_p0 = scmp.ge.s32.totalorder %s30_s23, 2  ;;  %p153_p1 = scmp.ne.s32.totalorder %s662_s17, %s658_s16 }
   0x8   : > { %p154_p2 = scmp.eq.s32.totalorder %s460_s21, 1  ;;  %p159_p3 = scmp.ne.s32.totalorder %s658_s16, %s654_s15 }
   0x9   : > { %s888_s23 = smov (%p32_p0, %s30_s23), 0  ;;  %p160_p5 = scmp.eq.s32.totalorder %s461_s22, 1 }
   0xa   : > { %p748_p4 = por %p154_p2, %p153_p1  ;;  %s138_s26 = ssub.s32 %s670_s19, %s888_s23 }
   0xb   : > { %p462_p6 = scmp.ge.s32.totalorder %s674_s20, 1  ;;  %p141_p7 = scmp.eq.s32.totalorder %s138_s26, 0 }
   0xc   : > { %s873_s25 = scalar_select %p748_p4, 1, 0 }
   0xd   : > { %p755_p8 = por %p160_p5, %p159_p3  ;;  %p167_p9 = scmp.lt.s32.totalorder %s674_s20, 3 }
   0xe   : > { %s761_s28 = scalar_select %p141_p7, %s662_s17, %s143_s24  }
   0xf   : > { %s874_s27 = scalar_select %p755_p8, 1, 0 }
  0x10   : > { %p763_p10 = pnand %p462_p6, %p167_p9  ;;  %p767_p11 = scmp.eq.s32.totalorder %s460_s21, 0 }
  0x11   : > { %s676_s5 = smov [#allocation2]   ;;  %s564_s10 = scalar_lea.hbm %s865_s1, 256 }
  0x12   : > { %s875_s29 = scalar_select %p763_p10, 1, 0 }
  0x13   : > { %s876_s30 = scalar_select %p767_p11, 1, 0 }
  0x14   : > { %p496_p12 = pneg %p763_p10  ;;  %s181_s6 = sshll.u32 %s676_s5, 4  ;;  %s182_s6 = int_to_ptr.vmem [resolvable:$true] %s181_s6 }
  0x15   : > { %p565_p0 = scmp.ne.s32.totalorder %s865_s1, %s564_s10  ;;  %p571_p5 = scmp.lt.u32.totalorder %s564_s10, %s865_s1 }
  0x16   : > { %p775_p13 = pnand %p767_p11, %p496_p12 }
  0x18   : > { %p566_p1 = pneg %p775_p13 }
  0x1a   : > { %p567_p2 = pnand %p566_p1, %p565_p0 }
  0x1c   : > { %p568_p3 = pneg %p567_p2 }
  0x1e   : > { %p573_p6 = pnand %p571_p5, %p568_p3 }
  0x20   : > { %576 = shalt.err (!%p573_p6)
}
  0x21   : > { %s577_s21 = scalar_lea.vmem %s182_s6, 256  ;;  %p585_p8 = scmp.lt.s32.totalorder %s182_s6, %s182_s6 }
  0x22   : > { %p578_p7 = scmp.ne.s32.totalorder %s182_s6, %s577_s21  ;;  %p586_p4 = scmp.lt.s32.totalorder %s577_s21, %s577_s21 }
  0x24   : > { %p580_p9 = pnand %p578_p7, %p566_p1  ;;  %p587_p11 = por %p586_p4, %p585_p8 }
  0x26   : > { %p581_p12 = pneg %p580_p9 }
  0x28   : > { %p588_p10 = pnand %p587_p11, %p581_p12 }
  0x2a   : > { %591 = shalt.err (!%p588_p10)
}
  0x2b   : > { %s677_s22 = smov 64   ;;  %s678_s24 = smov 4  }
  0x2c   : > { %499 = dma.hbm_to_vmem [thread:$0]  (!%p775_p13), %s865_s1, 256, %s182_s6, [#allocation3], %s677_s22, %s677_s22, %s678_s24  }
  0x2d   : > { %p878_p0 = scmp.ne.s32.totalorder %s875_s29, 0 }
  0x2e   : > { %p879_p2 = scmp.ne.s32.totalorder (!%p878_p0), %s876_s30, 0 }
  0x2f   : > { %217 = sbr.rel (%p878_p0) target bundleno = 292 (0x124), region = 36 }
  0x36   : > { %645 = dma.done.wait (%p879_p2), [#allocation3], 256  }
  0x37   : > { %647 = vsyncadd (%p879_p2), [#allocation3], 4294967040  ;;  %p249_p4 = scmp.lt.s32.totalorder %s666_s18, 1  ;;  %v679_v0 = vmov 0.0   ;;  %vm680_vm0 = vmmov 0   ;;  %v681_v1 = vmov 0  }
  0x38   : > { %482 = vmatprep.subr.bf16.mxu0 %v679_v0  ;;  %486 = vmatprep.mubr.msk.bf16.mxu0 %vm680_vm0, %v679_v0  ;;  %v562_v2 = vld [vmem:[#allocation2] sm:$0xff]   ;;  %v563_v3 = vld [vmem:[#allocation2 + $0x8] sm:$0xff]   ;;  %vm279_vm2 = vcmask 261120   ;;  %s246_s12 = sand.u32 1, %s658_s16   ;;  %s476_s14 = sshll.u32 %s666_s18, 7 }
  0x39   : > { %s250_s7 = scalar_select %p249_p4, %s666_s18, 1  ;;  %561 = vset.pattern.permute.xlu0 %v681_v1  ;;  %483 = vmatpush3.bf16.msra.mxu0 %v562_v2  ;;  %v474_v9 = vld [vmem:[%s867_s3] ss:$0 sm:$0xff] }
  0x3a   : > { %484 = vmatprep.subr.bf16.mxu0 %v679_v0  ;;  %s468_s13 = sshll.u32 %s246_s12, 3  ;;  %s340_s18 = scalar_lea.sflag [#allocation4], %s246_s12 }
  0x3b   : > { %s469_s6 = sshll.u32 %s250_s7, 3  ;;  %s248_s21 = scalar_lea.vmem [#allocation5], %s468_s13 }
  0x3c   : > { %s252_s9 = scalar_lea.vmem %s864_s0, %s469_s6  ;;  %s256_s30 = scalar_lea.vmem %s866_s2, %s469_s6 }
  0x3d   : > { %v261_v4 = vld [vmem:[%s252_s9] sm:$0xff]  ;;  %485 = vmatpush3.bf16.msra.mxu0 %v563_v3  ;;  %s354_s22 = sshll.u32 %s248_s21, 4  ;;  %s817_s6 = scalar_lea.hbm %s868_s4, %s476_s14  ;;  %s819_s22 = int_to_ptr.vmem [resolvable:$true] %s354_s22 }
  0x3e   : > { %v323_v5 = vld [vmem:[%s256_s30] sm:$0xff]  ;;  %v262_v7 = vpack.c.bf16 %v261_v4, %v261_v4  ;;  %s592_s8 = scalar_lea.vmem %s819_s22, 128  ;;  %p880_p10 = scmp.ne.s32.totalorder %s873_s25, 0 }
  0x3f   : > { %vm324_vm1 = vcmp.ne.s32.totalorder %v323_v5, 0  ;;  %p593_p8 = scmp.ne.s32.totalorder %s819_s22, %s592_s8  ;;  %s682_s29 = smov [#allocation5]  }
  0x40   : > { %v326_v6 = vsel %vm324_vm1, 1, %v681_v1  ;;  %487 = vmatmul.mubr.msk.bf16.vlgmr.msra.gmra.mrb[0].mxu0 %vm279_vm2, %v262_v7  ;;  %s596_s9 = sshll.u32 %s682_s29, 4  ;;  %s597_s9 = int_to_ptr.vmem [resolvable:$false] %s596_s9 }
  0x41   : > { %328 = vperm.xlu0 %561, %v326_v6   ;;  %p594_p11 = pnand %p593_p8, %p880_p10  ;;  %s598_s10 = scalar_lea.vmem %s597_s9, 256 }
  0x42   : > { %p599_p1 = scmp.lt.s32.totalorder %s819_s22, %s597_s9  ;;  %p600_p3 = scmp.lt.s32.totalorder %s598_s10, %s592_s8 }
  0x43   : > { %p595_p13 = pneg %p594_p11 }
  0x44   : > { %p601_p5 = por %p600_p3, %p599_p1 }
  0x46   : > { %p602_p6 = pnand %p601_p5, %p595_p13 }
  0xc0   : > { %v329_v8 = vpop.permute.xlu0 %328 }
  0xc1   : > { %vm330_vm3 = vcmp.eq.s32.totalorder %v329_v8, 1 }
 0x113   : > { %v317_v10 = vpop.f32.mrb[0].mxu0 }
 0x114   : > { %v337_v11 = vsel %vm330_vm3, %v317_v10, %v474_v9  ;;  %v488_v12 = vpop.f32.mrb[1].mxu0 }
 0x115   : > { %338 = vst [vmem:[%s248_s21] sm:$0xff] %v337_v11  ;;  %v320_v13 = vpop.f32.mrb[2].mxu0 }
 0x116   : > { %v489_v14 = vpop.f32.mrb[3].mxu0 }
 0x117   : > { %605 = shalt.err (!%p602_p6)
}
 0x118   : > { %s606_s11 = scalar_lea.hbm %s817_s6, 128  ;;  %s610_s13 = scalar_lea.hbm %s868_s4, 256 }
 0x119   : > { %p607_p7 = scmp.ne.s32.totalorder %s817_s6, %s606_s11  ;;  %p611_p0 = scmp.lt.u32.totalorder %s817_s6, %s868_s4 }
 0x11a   : > { %p612_p2 = scmp.lt.u32.totalorder %s610_s13, %s606_s11  ;;  %p614_p8 = scmp.lt.u32.totalorder %s606_s11, %s817_s6 }
 0x11b   : > { %p608_p9 = pnand %p607_p7, %p880_p10 }
 0x11c   : > { %p613_p4 = por %p612_p2, %p611_p0 }
 0x11d   : > { %p609_p12 = pneg %p608_p9 }
 0x11e   : > { %p615_p11 = por %p614_p8, %p613_p4 }
 0x120   : > { %p616_p13 = pnand %p615_p11, %p609_p12 }
 0x122   : > { %619 = shalt.err (!%p616_p13)
}
 0x123   : > { %494 = dma.vmem_to_hbm [thread:$0]  (%p880_p10), %s819_s22, 128, %s817_s6, %s340_s18  }
 0x124 PF: > { %p506_p1 = scmp.ge.s32.totalorder %s674_s20, 2  ;;  %s366_s24 = sand.u32 1, %s654_s15  }
 0x125   : > { %p881_p3 = scmp.ne.s32.totalorder %s874_s27, 0  ;;  %s367_s26 = scalar_lea.sflag [#allocation4], %s366_s24 }
 0x127   : > { %p501_p5 = pnand %p506_p1, %p881_p3 }
 0x129   : > { %649 = dma.done.wait (!%p501_p5), %s367_s26, 128  }
 0x12a   : > { %651 = vsyncadd (!%p501_p5), %s367_s26, 4294967168  ;;  %s18_s20 = sadd.s32 1, %s674_s20   ;;  %s882_s15 = smov %s658_s16 }
 0x12b   : > { %p15_p6 = scmp.ge.s32.totalorder %s18_s20, 4   ;;  %s883_s16 = smov %s662_s17 }
 0x12c   : > { %s884_s17 = smov %s761_s28  ;;  %s885_s18 = smov %s670_s19 }
 0x12d   : > { %s886_s19 = smov %s888_s23  ;;  %17 = sbr.rel (!%p15_p6) target bundleno = 5 (0x5), region = 83 }
 0x134   :  { %372 = vsyncpa [#allocation3], 1 }
 0x135   :  { %374 = vsyncpa [#allocation3 + $0x1], 1 }
 0x136   :  { %375 = vsyncpa [#allocation4], 1 }
 0x137   :  { %377 = vsyncpa [#allocation4 + $0x1], 1 }

// kernel: tpu_custom_call.1
= control target key start
LH: loop header
LB: loop body
LE: loop exit
PB: predicated region body
PF: predicated region fallthrough
CT: control target
= control target key end

     0   :  { %9 = vsyncpa [#allocation3], 0  ;;  %s864_s0 = inlined_call_operand.vmem [shape: f32[16,32], index: 0, kind: input, shape index: {}]   ;;  %s865_s1 = inlined_call_operand.hbm [shape: bf16[32,128], index: 1, kind: input, shape index: {}]   ;;  %s866_s2 = inlined_call_operand.vmem [shape: s32[16,1], index: 2, kind: input, shape index: {}]   ;;  %s867_s3 = inlined_call_operand.vmem [shape: f32[1,128], index: 3, kind: input, shape index: {}]   ;;  %s868_s4 = inlined_call_operand.hbm [shape: f32[16,128], index: 4, kind: output, shape index: {}]  }
   0x1   :  { %10 = vsyncpa [#allocation4], 0 }
   0x2   :  { %12 = vsyncpa [#allocation4 + $0x1], 0  ;;  %s708_s15 = smov 0   ;;  %s710_s16 = smov 0  }
   0x3   :  { %s712_s17 = smov 0   ;;  %s714_s18 = smov 0  }
   0x4   :  { %s716_s19 = smov 0   ;;  %s718_s20 = smov 0  }
   0x5 LB: > { %s460_s21 = sadd.s32 4294967295, %s674_s20   ;;  %s461_s22 = sadd.s32 4294967294, %s674_s20   ;;  %s674_s20 = sphi %s718_s20, %s18_s20   ;;  %s670_s19 = sphi %s716_s19, %s886_s19   ;;  %s666_s18 = sphi %s714_s18, %s885_s18   ;;  %s662_s17 = sphi %s712_s17, %s884_s17   ;;  %s658_s16 = sphi %s710_s16, %s883_s16   ;;  %s654_s15 = sphi %s708_s15, %s882_s15  }
   0x6   : > { %s30_s23 = sadd.s32 1, %s670_s19  ;;  %s143_s24 = sadd.s32 1, %s662_s17 }
   0x7   : > { %p32_p0 = scmp.ge.s32.totalorder %s30_s23, 2  ;;  %p153_p1 = scmp.ne.s32.totalorder %s662_s17, %s658_s16 }
   0x8   : > { %p154_p2 = scmp.eq.s32.totalorder %s460_s21, 1  ;;  %p159_p3 = scmp.ne.s32.totalorder %s658_s16, %s654_s15 }
   0x9   : > { %s888_s23 = smov (%p32_p0, %s30_s23), 0  ;;  %p160_p5 = scmp.eq.s32.totalorder %s461_s22, 1 }
   0xa   : > { %p748_p4 = por %p154_p2, %p153_p1  ;;  %s138_s26 = ssub.s32 %s670_s19, %s888_s23 }
   0xb   : > { %p462_p6 = scmp.ge.s32.totalorder %s674_s20, 1  ;;  %p141_p7 = scmp.eq.s32.totalorder %s138_s26, 0 }
   0xc   : > { %s873_s25 = scalar_select %p748_p4, 1, 0 }
   0xd   : > { %p755_p8 = por %p160_p5, %p159_p3  ;;  %p167_p9 = scmp.lt.s32.totalorder %s674_s20, 3 }
   0xe   : > { %s761_s28 = scalar_select %p141_p7, %s662_s17, %s143_s24  }
   0xf   : > { %s874_s27 = scalar_select %p755_p8, 1, 0 }
  0x10   : > { %p763_p10 = pnand %p462_p6, %p167_p9  ;;  %p767_p11 = scmp.eq.s32.totalorder %s460_s21, 0 }
  0x11   : > { %s676_s5 = smov [#allocation2]   ;;  %s564_s10 = scalar_lea.hbm %s865_s1, 256 }
  0x12   : > { %s875_s29 = scalar_select %p763_p10, 1, 0 }
  0x13   : > { %s876_s30 = scalar_select %p767_p11, 1, 0 }
  0x14   : > { %p496_p12 = pneg %p763_p10  ;;  %s181_s6 = sshll.u32 %s676_s5, 4  ;;  %s182_s6 = int_to_ptr.vmem [resolvable:$true] %s181_s6 }
  0x15   : > { %p565_p0 = scmp.ne.s32.totalorder %s865_s1, %s564_s10  ;;  %p571_p5 = scmp.lt.u32.totalorder %s564_s10, %s865_s1 }
  0x16   : > { %p775_p13 = pnand %p767_p11, %p496_p12 }
  0x18   : > { %p566_p1 = pneg %p775_p13 }
  0x1a   : > { %p567_p2 = pnand %p566_p1, %p565_p0 }
  0x1c   : > { %p568_p3 = pneg %p567_p2 }
  0x1e   : > { %p573_p6 = pnand %p571_p5, %p568_p3 }
  0x20   : > { %576 = shalt.err (!%p573_p6)
}
  0x21   : > { %s577_s21 = scalar_lea.vmem %s182_s6, 256  ;;  %p585_p8 = scmp.lt.s32.totalorder %s182_s6, %s182_s6 }
  0x22   : > { %p578_p7 = scmp.ne.s32.totalorder %s182_s6, %s577_s21  ;;  %p586_p4 = scmp.lt.s32.totalorder %s577_s21, %s577_s21 }
  0x24   : > { %p580_p9 = pnand %p578_p7, %p566_p1  ;;  %p587_p11 = por %p586_p4, %p585_p8 }
  0x26   : > { %p581_p12 = pneg %p580_p9 }
  0x28   : > { %p588_p10 = pnand %p587_p11, %p581_p12 }
  0x2a   : > { %591 = shalt.err (!%p588_p10)
}
  0x2b   : > { %s677_s22 = smov 64   ;;  %s678_s24 = smov 4  }
  0x2c   : > { %499 = dma.hbm_to_vmem [thread:$0]  (!%p775_p13), %s865_s1, 256, %s182_s6, [#allocation3], %s677_s22, %s677_s22, %s678_s24  }
  0x2d   : > { %p878_p0 = scmp.ne.s32.totalorder %s875_s29, 0 }
  0x2e   : > { %p879_p2 = scmp.ne.s32.totalorder (!%p878_p0), %s876_s30, 0 }
  0x2f   : > { %217 = sbr.rel (%p878_p0) target bundleno = 292 (0x124), region = 36 }
  0x36   : > { %645 = dma.done.wait (%p879_p2), [#allocation3], 256  }
  0x37   : > { %647 = vsyncadd (%p879_p2), [#allocation3], 4294967040  ;;  %p249_p4 = scmp.lt.s32.totalorder %s666_s18, 1  ;;  %v679_v0 = vmov 0.0   ;;  %vm680_vm0 = vmmov 0   ;;  %v681_v1 = vmov 0  }
  0x38   : > { %482 = vmatprep.subr.bf16.mxu0 %v679_v0  ;;  %486 = vmatprep.mubr.msk.bf16.mxu0 %vm680_vm0, %v679_v0  ;;  %v562_v2 = vld [vmem:[#allocation2] sm:$0xff]   ;;  %v563_v3 = vld [vmem:[#allocation2 + $0x8] sm:$0xff]   ;;  %vm279_vm2 = vcmask 261120   ;;  %s246_s12 = sand.u32 1, %s658_s16   ;;  %s476_s14 = sshll.u32 %s666_s18, 7 }
  0x39   : > { %s250_s7 = scalar_select %p249_p4, %s666_s18, 1  ;;  %561 = vset.pattern.permute.xlu0 %v681_v1  ;;  %483 = vmatpush3.bf16.msra.mxu0 %v562_v2  ;;  %v474_v9 = vld [vmem:[%s867_s3] ss:$0 sm:$0xff] }
  0x3a   : > { %484 = vmatprep.subr.bf16.mxu0 %v679_v0  ;;  %s468_s13 = sshll.u32 %s246_s12, 3  ;;  %s340_s18 = scalar_lea.sflag [#allocation4], %s246_s12 }
  0x3b   : > { %s469_s6 = sshll.u32 %s250_s7, 3  ;;  %s248_s21 = scalar_lea.vmem [#allocation5], %s468_s13 }
  0x3c   : > { %s252_s9 = scalar_lea.vmem %s864_s0, %s469_s6  ;;  %s256_s30 = scalar_lea.vmem %s866_s2, %s469_s6 }
  0x3d   : > { %v261_v4 = vld [vmem:[%s252_s9] sm:$0xff]  ;;  %485 = vmatpush3.bf16.msra.mxu0 %v563_v3  ;;  %s354_s22 = sshll.u32 %s248_s21, 4  ;;  %s817_s6 = scalar_lea.hbm %s868_s4, %s476_s14  ;;  %s819_s22 = int_to_ptr.vmem [resolvable:$true] %s354_s22 }
  0x3e   : > { %v323_v5 = vld [vmem:[%s256_s30] sm:$0xff]  ;;  %v262_v7 = vpack.c.bf16 %v261_v4, %v261_v4  ;;  %s592_s8 = scalar_lea.vmem %s819_s22, 128  ;;  %p880_p10 = scmp.ne.s32.totalorder %s873_s25, 0 }
  0x3f   : > { %vm324_vm1 = vcmp.ne.s32.totalorder %v323_v5, 0  ;;  %p593_p8 = scmp.ne.s32.totalorder %s819_s22, %s592_s8  ;;  %s682_s29 = smov [#allocation5]  }
  0x40   : > { %v326_v6 = vsel %vm324_vm1, 1, %v681_v1  ;;  %487 = vmatmul.mubr.msk.bf16.vlgmr.msra.gmra.mrb[0].mxu0 %vm279_vm2, %v262_v7  ;;  %s596_s9 = sshll.u32 %s682_s29, 4  ;;  %s597_s9 = int_to_ptr.vmem [resolvable:$false] %s596_s9 }
  0x41   : > { %328 = vperm.xlu0 %561, %v326_v6   ;;  %p594_p11 = pnand %p593_p8, %p880_p10  ;;  %s598_s10 = scalar_lea.vmem %s597_s9, 256 }
  0x42   : > { %p599_p1 = scmp.lt.s32.totalorder %s819_s22, %s597_s9  ;;  %p600_p3 = scmp.lt.s32.totalorder %s598_s10, %s592_s8 }
  0x43   : > { %p595_p13 = pneg %p594_p11 }
  0x44   : > { %p601_p5 = por %p600_p3, %p599_p1 }
  0x46   : > { %p602_p6 = pnand %p601_p5, %p595_p13 }
  0xc0   : > { %v329_v8 = vpop.permute.xlu0 %328 }
  0xc1   : > { %vm330_vm3 = vcmp.eq.s32.totalorder %v329_v8, 1 }
 0x113   : > { %v317_v10 = vpop.f32.mrb[0].mxu0 }
 0x114   : > { %v337_v11 = vsel %vm330_vm3, %v317_v10, %v474_v9  ;;  %v488_v12 = vpop.f32.mrb[1].mxu0 }
 0x115   : > { %338 = vst [vmem:[%s248_s21] sm:$0xff] %v337_v11  ;;  %v320_v13 = vpop.f32.mrb[2].mxu0 }
 0x116   : > { %v489_v14 = vpop.f32.mrb[3].mxu0 }
 0x117   : > { %605 = shalt.err (!%p602_p6)
}
 0x118   : > { %s606_s11 = scalar_lea.hbm %s817_s6, 128  ;;  %s610_s13 = scalar_lea.hbm %s868_s4, 256 }
 0x119   : > { %p607_p7 = scmp.ne.s32.totalorder %s817_s6, %s606_s11  ;;  %p611_p0 = scmp.lt.u32.totalorder %s817_s6, %s868_s4 }
 0x11a   : > { %p612_p2 = scmp.lt.u32.totalorder %s610_s13, %s606_s11  ;;  %p614_p8 = scmp.lt.u32.totalorder %s606_s11, %s817_s6 }
 0x11b   : > { %p608_p9 = pnand %p607_p7, %p880_p10 }
 0x11c   : > { %p613_p4 = por %p612_p2, %p611_p0 }
 0x11d   : > { %p609_p12 = pneg %p608_p9 }
 0x11e   : > { %p615_p11 = por %p614_p8, %p613_p4 }
 0x120   : > { %p616_p13 = pnand %p615_p11, %p609_p12 }
 0x122   : > { %619 = shalt.err (!%p616_p13)
}
 0x123   : > { %494 = dma.vmem_to_hbm [thread:$0]  (%p880_p10), %s819_s22, 128, %s817_s6, %s340_s18  }
 0x124 PF: > { %p506_p1 = scmp.ge.s32.totalorder %s674_s20, 2  ;;  %s366_s24 = sand.u32 1, %s654_s15  }
 0x125   : > { %p881_p3 = scmp.ne.s32.totalorder %s874_s27, 0  ;;  %s367_s26 = scalar_lea.sflag [#allocation4], %s366_s24 }
 0x127   : > { %p501_p5 = pnand %p506_p1, %p881_p3 }
 0x129   : > { %649 = dma.done.wait (!%p501_p5), %s367_s26, 128  }
 0x12a   : > { %651 = vsyncadd (!%p501_p5), %s367_s26, 4294967168  ;;  %s18_s20 = sadd.s32 1, %s674_s20   ;;  %s882_s15 = smov %s658_s16 }
 0x12b   : > { %p15_p6 = scmp.ge.s32.totalorder %s18_s20, 4   ;;  %s883_s16 = smov %s662_s17 }
 0x12c   : > { %s884_s17 = smov %s761_s28  ;;  %s885_s18 = smov %s670_s19 }
 0x12d   : > { %s886_s19 = smov %s888_s23  ;;  %17 = sbr.rel (!%p15_p6) target bundleno = 5 (0x5), region = 83 }
 0x134   :  { %372 = vsyncpa [#allocation3], 1 }
 0x135   :  { %374 = vsyncpa [#allocation3 + $0x1], 1 }
 0x136   :  { %375 = vsyncpa [#allocation4], 1 }
 0x137   :  { %377 = vsyncpa [#allocation4 + $0x1], 1 }

</bundles_post_ra>
